<compile_context>
chip_gen: v7x
topology: tpu7x:2x2x1
jax: 0.10.0
libtpu: 0.0.40
codegen_flags: <defaults>
</compile_context>

<pallas_src>
import functools

import jax
import jax.numpy as jnp
import numpy as np
from jax.experimental import pallas as pl
from jax.experimental.pallas import tpu as pltpu


# ----------------------------- helpers ---------------------------------------


def _round_up(v, m):
    return ((v + m - 1) // m) * m


def _log_softmax(z):
    # log_softmax along the last axis (classes of one level), f32 math.
    m = jnp.max(z, axis=-1, keepdims=True)
    zs = z - m
    lse = jnp.log(jnp.sum(jnp.exp(zs), axis=-1, keepdims=True))
    return zs - lse


# ----------------------------- kernel ---------------------------------------


def make_bhcn_awx_kernel(levels, awx_norm):
    """Build a Pallas kernel closed over the (static) hierarchy structure."""
    depth = len(levels)
    offsets = (0,) + tuple(int(sum(levels[: i + 1])) for i in range(depth))
    n_param = 2 + 3 * (depth - 1) + 1  # W0^T, b0, (Wa_i, Wb_i, b_i)*, R^T

    def kernel(x_ref, *refs):
        param_refs = refs[:n_param]
        out_local_ref = refs[n_param]
        out_awx_ref = refs[n_param + 1]

        x = x_ref[...]                          # (TB, D), compute dtype

        # Zero the lane-padded local-output block once, then stream per-level
        # pieces directly into their static sub-slices (no concat relayout).
        out_local_ref[...] = jnp.zeros_like(out_local_ref)

        # ----- level 0: x @ W0^T + b0 -----
        w0t = param_refs[0][...]                # (D, L0)
        b0 = param_refs[1][...]                 # (1, L0) f32
        out = jnp.dot(x, w0t, preferred_element_type=jnp.float32) + b0
        out_local_ref[:, offsets[0]:offsets[1]] = _log_softmax(out)
        prev = out                              # f32 logits

        # ----- levels 1..depth-1 -----
        p = 2
        for i in range(1, depth):
            wa = param_refs[p][...]             # (L_{i-1}, L_i)
            wb = param_refs[p + 1][...]         # (D, L_i)
            bi = param_refs[p + 2][...]         # (1, L_i) f32
            p += 3

            # ReLU then LayerNorm(levels[i-1], no affine), all in f32.
            h = jnp.maximum(prev, 0.0)
            mean = jnp.mean(h, axis=-1, keepdims=True)
            d = h - mean
            var = jnp.mean(d * d, axis=-1, keepdims=True)
            hn = d * jax.lax.rsqrt(var + 1e-5)

            # cat([hn, x]) @ Wi^T  ==  hn @ Wa + x @ Wb   (split done in wrapper)
            out = (jnp.dot(hn.astype(wa.dtype), wa,
                           preferred_element_type=jnp.float32)
                   + jnp.dot(x, wb, preferred_element_type=jnp.float32)
                   + bi)
            out_local_ref[:, offsets[i]:offsets[i + 1]] = _log_softmax(out)
            prev = out

        # ----- AWX layer on the leaf-level logits -----
        r = param_refs[n_param - 1][...]        # (n_leaves, n_classes_pad)
        s = jax.nn.sigmoid(prev)                # (TB, n_leaves), f32
        if awx_norm > 1:
            # (s * R)^n summed over leaves == s^n @ (R^n)^T  (s, R >= 0);
            # wrapper passes R^T already raised to the n-th power.
            sp = s ** awx_norm
            val = jnp.dot(sp.astype(r.dtype), r,
                          preferred_element_type=jnp.float32)
            val = jnp.clip(val, 1e-6, 1.0 - 1e-6)
            awx = val ** (1.0 / awx_norm)
        elif awx_norm > 0:
            awx = jnp.minimum(
                jnp.dot(s.astype(r.dtype), r,
                        preferred_element_type=jnp.float32),
                1.0 - 1e-4)
        else:
            # TODO(synk): tile over the class axis for very large hierarchies
            # instead of materializing the (TB, n_leaves, n_classes_pad) product.
            awx = jnp.max(s[:, :, None] * r[None, :, :].astype(jnp.float32),
                          axis=1)
        out_awx_ref[...] = awx.astype(out_awx_ref.dtype)

    return kernel


# ----------------------------- wrapper ---------------------------------------


@functools.partial(
    jax.jit,
    static_argnames=("levels", "awx_norm", "compute_dtype", "batch_tile"))
def bhcn_awx_forward(x, weights, biases, R, *, levels, awx_norm,
                     compute_dtype=jnp.bfloat16, batch_tile=512):
    """Run the BHCN_AWX forward pass with a batch-tiled Pallas kernel.

    batch_tile: rows per grid step. 512 is a good v5e/v6e default (128 MiB
    VMEM); use ~256 on v7x (64 MiB VMEM, 2 TensorCores).
    """
    levels = tuple(int(l) for l in levels)
    depth = len(levels)
    n_classes = int(sum(levels))
    n_classes_pad = _round_up(n_classes, 128)
    B, input_dim = x.shape

    # Batch tiling: pad B up to a multiple of the tile so every block is full.
    tb = min(int(batch_tile), _round_up(B, 8))
    B_pad = _round_up(B, tb)
    x_p = jnp.pad(x, ((0, B_pad - B), (0, 0))).astype(compute_dtype)

    # Pre-transpose / pre-split weights (PyTorch Linear is out x in) so the
    # kernel never transposes nor slices weights at lane-unaligned offsets.
    flat_params = [weights[0].T.astype(compute_dtype),            # (D, L0)
                   biases[0].reshape(1, -1).astype(jnp.float32)]  # (1, L0)
    for i in range(1, depth):
        lp = levels[i - 1]
        wi = weights[i]                                           # (L_i, lp + D)
        flat_params.append(wi[:, :lp].T.astype(compute_dtype))    # (lp, L_i)
        flat_params.append(wi[:, lp:].T.astype(compute_dtype))    # (D,  L_i)
        flat_params.append(biases[i].reshape(1, -1).astype(jnp.float32))

    # AWX matrix: (R or R**n) transposed and lane-padded to n_classes_pad.
    Rm = R ** awx_norm if awx_norm > 1 else R
    r_dtype = compute_dtype if awx_norm > 0 else jnp.float32
    RT = jnp.pad(Rm.T, ((0, 0), (0, n_classes_pad - n_classes))).astype(r_dtype)
    flat_params.append(RT)                                        # (n_leaves, Cpad)

    kernel = make_bhcn_awx_kernel(levels, awx_norm)

    def const_spec(a):
        # Grid-invariant full-array block: stays resident in VMEM.
        return pl.BlockSpec(a.shape, lambda i: (0, 0))

    in_specs = [pl.BlockSpec((tb, input_dim), lambda i: (i, 0))]
    in_specs += [const_spec(a) for a in flat_params]
    out_spec = pl.BlockSpec((tb, n_classes_pad), lambda i: (i, 0))

    out_local, out_awx = pl.pallas_call(
        kernel,
        grid=(B_pad // tb,),
        out_shape=(
            jax.ShapeDtypeStruct((B_pad, n_classes_pad), jnp.float32),
            jax.ShapeDtypeStruct((B_pad, n_classes_pad), jnp.float32),
        ),
        in_specs=in_specs,
        out_specs=(out_spec, out_spec),
        compiler_params=pltpu.CompilerParams(
            dimension_semantics=("parallel",),
            # Raise the scoped-VMEM ceiling (v5e defaults to 16 MiB); stays
            # under v7x's 64 MiB physical VMEM.
            vmem_limit_bytes=48 * 1024 * 1024,
        ),
    )(x_p, *flat_params)

    # Slice off batch padding and the lane padding of the class axis.
    return out_local[:B, :n_classes], out_awx[:B, :n_classes]


# ----------------------------- pure-JAX reference -----------------------------


def bhcn_awx_reference(x, weights, biases, R, levels, awx_norm):
    depth = len(levels)
    out = x @ weights[0].T + biases[0]
    pieces = [jax.nn.log_softmax(out, axis=1)]
    prev = out
    for i in range(1, depth):
        h = jnp.maximum(prev, 0.0)
        mean = h.mean(axis=1, keepdims=True)
        var = ((h - mean) ** 2).mean(axis=1, keepdims=True)
        hn = (h - mean) / jnp.sqrt(var + 1e-5)
        cat = jnp.concatenate([hn, x], axis=1)
        out = cat @ weights[i].T + biases[i]
        pieces.append(jax.nn.log_softmax(out, axis=1))
        prev = out
    local = jnp.concatenate(pieces, axis=1)
    s = jax.nn.sigmoid(prev)
    if awx_norm > 1:
        prod = s[:, None, :] * R[None, :, :]
        awx = jnp.clip(jnp.sum(prod ** awx_norm, axis=-1),
                       1e-6, 1 - 1e-6) ** (1.0 / awx_norm)
    elif awx_norm > 0:
        awx = jnp.minimum(s @ R.T, 1 - 1e-4)
    else:
        awx = jnp.max(s[:, None, :] * R[None, :, :], axis=-1)
    return local, awx


# ----------------------------- main -------------------------------------------


if __name__ == "__main__":
    # Small synthetic hierarchy: 3 levels with sizes [4, 6, 8].
    levels = (4, 6, 8)
    depth = len(levels)
    level_offsets = (0, 4, 10, 18)
    n_classes = 18
    input_dim = 32
    batch = 8
    awx_norm = 1  # config['awx_norm']

    key = jax.random.PRNGKey(0)
    keys = jax.random.split(key, 2 * depth + 1)

    # Deterministic parameter init (xavier-uniform-like scale).
    weights, biases = [], []
    fan_in = input_dim
    for i, lvl in enumerate(levels):
        limit = (6.0 / (fan_in + lvl)) ** 0.5
        w = jax.random.uniform(keys[2 * i], (lvl, fan_in), jnp.float32, -limit, limit)
        b = jax.random.uniform(keys[2 * i + 1], (lvl,), jnp.float32, -0.1, 0.1)
        weights.append(w)
        biases.append(b)
        fan_in = input_dim + lvl  # next level takes cat([norm(prev), x])

    # Deterministic AWX R matrix (already transposed): (n_classes, n_leaves).
    n_leaves = levels[-1]
    R_np = np.zeros((n_classes, n_leaves), dtype=np.float32)
    for j in range(n_leaves):
        leaf_global = level_offsets[2] + j
        l1 = j % levels[1]
        l0 = l1 % levels[0]
        R_np[leaf_global, j] = 1.0
        R_np[level_offsets[1] + l1, j] = 1.0
        R_np[level_offsets[0] + l0, j] = 1.0
    R = jnp.asarray(R_np)

    x = jax.random.normal(keys[-1], (batch, input_dim), jnp.float32)

    ref_local, ref_awx = bhcn_awx_reference(x, weights, biases, R, levels, awx_norm)

    # 1) f32 MXU path: matches the PyTorch forward numerics tightly.
    local_f32, awx_f32 = bhcn_awx_forward(
        x, tuple(weights), tuple(biases), R,
        levels=levels, awx_norm=awx_norm, compute_dtype=jnp.float32)
    jax.block_until_ready((local_f32, awx_f32))
    assert local_f32.shape == (batch, n_classes) and awx_f32.shape == (batch, n_classes)
    assert jnp.allclose(local_f32, ref_local, atol=1e-5, rtol=1e-5)
    assert jnp.allclose(awx_f32, ref_awx, atol=1e-5, rtol=1e-5)

    # 2) default optimized path: bf16 MXU inputs, f32 accumulation.
    local_bf16, awx_bf16 = bhcn_awx_forward(
        x, tuple(weights), tuple(biases), R, levels=levels, awx_norm=awx_norm)
    jax.block_until_ready((local_bf16, awx_bf16))
    assert jnp.allclose(local_bf16, ref_local, atol=1e-1, rtol=1e-1)
    assert jnp.allclose(awx_bf16, ref_awx, atol=5e-2, rtol=5e-2)

    # 3) awx_norm > 1 branch (rewritten as s**n @ (R**n)^T on the MXU).
    ref_local2, ref_awx2 = bhcn_awx_reference(x, weights, biases, R, levels, 2)
    local2, awx2 = bhcn_awx_forward(
        x, tuple(weights), tuple(biases), R,
        levels=levels, awx_norm=2, compute_dtype=jnp.float32)
    jax.block_until_ready((local2, awx2))
    assert jnp.allclose(local2, ref_local2, atol=1e-4, rtol=1e-4)
    assert jnp.allclose(awx2, ref_awx2, atol=1e-4, rtol=1e-4)

    print("KERNEL_OK")
</pallas_src>

<mosaic_0001>
module attributes {stable_mosaic.version = 11 : i64} {
  func.func @kernel(%arg0: i32, %arg1: memref<8x32xf32, #tpu.memory_space<vmem>>, %arg2: memref<32x4xf32, #tpu.memory_space<vmem>>, %arg3: memref<1x4xf32, #tpu.memory_space<vmem>>, %arg4: memref<4x6xf32, #tpu.memory_space<vmem>>, %arg5: memref<32x6xf32, #tpu.memory_space<vmem>>, %arg6: memref<1x6xf32, #tpu.memory_space<vmem>>, %arg7: memref<6x8xf32, #tpu.memory_space<vmem>>, %arg8: memref<32x8xf32, #tpu.memory_space<vmem>>, %arg9: memref<1x8xf32, #tpu.memory_space<vmem>>, %arg10: memref<8x128xf32, #tpu.memory_space<vmem>>, %arg11: memref<8x128xf32, #tpu.memory_space<vmem>>, %arg12: memref<8x128xf32, #tpu.memory_space<vmem>>) attributes {dimension_semantics = [#tpu.dimension_semantics<parallel>], iteration_bounds = array<i64: 1>, scalar_prefetch = 0 : i64, scratch_operands = 0 : i64, tpu.core_type = #tpu.core_type<tc>, window_params = [{transform_indices = @transform_0, window_bounds = array<i64: 8, 32>}, {pipeline_mode = #tpu.pipeline_mode<synchronous>, transform_indices = @transform_1, window_bounds = array<i64: 32, 4>}, {pipeline_mode = #tpu.pipeline_mode<synchronous>, transform_indices = @transform_2, window_bounds = array<i64: 1, 4>}, {pipeline_mode = #tpu.pipeline_mode<synchronous>, transform_indices = @transform_3, window_bounds = array<i64: 4, 6>}, {pipeline_mode = #tpu.pipeline_mode<synchronous>, transform_indices = @transform_4, window_bounds = array<i64: 32, 6>}, {pipeline_mode = #tpu.pipeline_mode<synchronous>, transform_indices = @transform_5, window_bounds = array<i64: 1, 6>}, {pipeline_mode = #tpu.pipeline_mode<synchronous>, transform_indices = @transform_6, window_bounds = array<i64: 6, 8>}, {pipeline_mode = #tpu.pipeline_mode<synchronous>, transform_indices = @transform_7, window_bounds = array<i64: 32, 8>}, {pipeline_mode = #tpu.pipeline_mode<synchronous>, transform_indices = @transform_8, window_bounds = array<i64: 1, 8>}, {pipeline_mode = #tpu.pipeline_mode<synchronous>, transform_indices = @transform_9, window_bounds = array<i64: 8, 128>}, {transform_indices = @transform_10, window_bounds = array<i64: 8, 128>}, {transform_indices = @transform_11, window_bounds = array<i64: 8, 128>}]} {
    %c0 = arith.constant 0 : index
    %c0_0 = arith.constant 0 : index
    %0 = vector.load %arg1[%c0, %c0_0] : memref<8x32xf32, #tpu.memory_space<vmem>>, vector<8x32xf32>
    %cst = arith.constant 0.000000e+00 : f32
    %1 = vector.broadcast %cst : f32 to vector<8x128xf32>
    %c0_1 = arith.constant 0 : index
    %c0_2 = arith.constant 0 : index
    %2 = vector.load %arg11[%c0_1, %c0_2] : memref<8x128xf32, #tpu.memory_space<vmem>>, vector<8x128xf32>
    tpu.vector_store %arg11[%c0_1, %c0_2], %1 {strides = array<i32>} : memref<8x128xf32, #tpu.memory_space<vmem>>, vector<8x128xf32>,
    %c0_3 = arith.constant 0 : index
    %c0_4 = arith.constant 0 : index
    %3 = vector.load %arg2[%c0_3, %c0_4] : memref<32x4xf32, #tpu.memory_space<vmem>>, vector<32x4xf32>
    %c0_5 = arith.constant 0 : index
    %c0_6 = arith.constant 0 : index
    %4 = vector.load %arg3[%c0_5, %c0_6] : memref<1x4xf32, #tpu.memory_space<vmem>>, vector<1x4xf32>
    %cst_7 = arith.constant dense<0.000000e+00> : vector<8x4xf32>
    %5 = tpu.matmul %0, %3, %cst_7 {dimension_numbers = #tpu.dot_dimension_numbers<[1], [0], [0], [1], [0, 0, 1, 1], [], []>} : vector<8x32xf32>, vector<32x4xf32>, vector<8x4xf32> -> vector<8x4xf32>
    %6 = vector.broadcast %4 : vector<1x4xf32> to vector<8x4xf32>
    %7 = arith.addf %5, %6 : vector<8x4xf32>
    %cst_8 = arith.constant dense<0xFF800000> : vector<8xf32>
    %8 = vector.multi_reduction <maximumf>, %7, %cst_8 [1] : vector<8x4xf32> to vector<8xf32>
    %9 = vector.shape_cast %8 : vector<8xf32> to vector<8x1xf32>
    %10 = vector.broadcast %9 : vector<8x1xf32> to vector<8x4xf32>
    %11 = arith.subf %7, %10 : vector<8x4xf32>
    %12 = math.exp %11 : vector<8x4xf32>
    %cst_9 = arith.constant dense<0.000000e+00> : vector<8xf32>
    %13 = vector.multi_reduction <add>, %12, %cst_9 [1] : vector<8x4xf32> to vector<8xf32>
    %14 = vector.shape_cast %13 : vector<8xf32> to vector<8x1xf32>
    %15 = math.log %14 : vector<8x1xf32>
    %16 = vector.broadcast %15 : vector<8x1xf32> to vector<8x4xf32>
    %17 = arith.subf %11, %16 : vector<8x4xf32>
    %c0_10 = arith.constant 0 : index
    %c0_11 = arith.constant 0 : index
    %18 = vector.load %arg11[%c0_10, %c0_11] : memref<8x128xf32, #tpu.memory_space<vmem>>, vector<8x4xf32>
    tpu.vector_store %arg11[%c0_10, %c0_11], %17 {strides = array<i32>} : memref<8x128xf32, #tpu.memory_space<vmem>>, vector<8x4xf32>,
    %c0_12 = arith.constant 0 : index
    %c0_13 = arith.constant 0 : index
    %19 = vector.load %arg4[%c0_12, %c0_13] : memref<4x6xf32, #tpu.memory_space<vmem>>, vector<4x6xf32>
    %c0_14 = arith.constant 0 : index
    %c0_15 = arith.constant 0 : index
    %20 = vector.load %arg5[%c0_14, %c0_15] : memref<32x6xf32, #tpu.memory_space<vmem>>, vector<32x6xf32>
    %c0_16 = arith.constant 0 : index
    %c0_17 = arith.constant 0 : index
    %21 = vector.load %arg6[%c0_16, %c0_17] : memref<1x6xf32, #tpu.memory_space<vmem>>, vector<1x6xf32>
    %cst_18 = arith.constant 0.000000e+00 : f32
    %22 = vector.broadcast %cst_18 : f32 to vector<8x4xf32>
    %23 = arith.maximumf %7, %22 : vector<8x4xf32>
    %cst_19 = arith.constant dense<0.000000e+00> : vector<8xf32>
    %24 = vector.multi_reduction <add>, %23, %cst_19 [1] : vector<8x4xf32> to vector<8xf32>
    %25 = vector.shape_cast %24 : vector<8xf32> to vector<8x1xf32>
    %cst_20 = arith.constant 4.000000e+00 : f32
    %26 = vector.broadcast %cst_20 : f32 to vector<8x1xf32>
    %27 = arith.divf %25, %26 : vector<8x1xf32>
    %28 = vector.broadcast %27 : vector<8x1xf32> to vector<8x4xf32>
    %29 = arith.subf %23, %28 : vector<8x4xf32>
    %30 = arith.mulf %29, %29 : vector<8x4xf32>
    %cst_21 = arith.constant dense<0.000000e+00> : vector<8xf32>
    %31 = vector.multi_reduction <add>, %30, %cst_21 [1] : vector<8x4xf32> to vector<8xf32>
    %32 = vector.shape_cast %31 : vector<8xf32> to vector<8x1xf32>
    %cst_22 = arith.constant 4.000000e+00 : f32
    %33 = vector.broadcast %cst_22 : f32 to vector<8x1xf32>
    %34 = arith.divf %32, %33 : vector<8x1xf32>
    %cst_23 = arith.constant 9.99999974E-6 : f32
    %35 = vector.broadcast %cst_23 : f32 to vector<8x1xf32>
    %36 = arith.addf %34, %35 : vector<8x1xf32>
    %37 = math.rsqrt %36 : vector<8x1xf32>
    %38 = vector.broadcast %37 : vector<8x1xf32> to vector<8x4xf32>
    %39 = arith.mulf %29, %38 : vector<8x4xf32>
    %cst_24 = arith.constant dense<0.000000e+00> : vector<8x6xf32>
    %40 = tpu.matmul %39, %19, %cst_24 {dimension_numbers = #tpu.dot_dimension_numbers<[1], [0], [0], [1], [0, 0, 1, 1], [], []>} : vector<8x4xf32>, vector<4x6xf32>, vector<8x6xf32> -> vector<8x6xf32>
    %cst_25 = arith.constant dense<0.000000e+00> : vector<8x6xf32>
    %41 = tpu.matmul %0, %20, %cst_25 {dimension_numbers = #tpu.dot_dimension_numbers<[1], [0], [0], [1], [0, 0, 1, 1], [], []>} : vector<8x32xf32>, vector<32x6xf32>, vector<8x6xf32> -> vector<8x6xf32>
    %42 = arith.addf %40, %41 : vector<8x6xf32>
    %43 = vector.broadcast %21 : vector<1x6xf32> to vector<8x6xf32>
    %44 = arith.addf %42, %43 : vector<8x6xf32>
    %cst_26 = arith.constant dense<0xFF800000> : vector<8xf32>
    %45 = vector.multi_reduction <maximumf>, %44, %cst_26 [1] : vector<8x6xf32> to vector<8xf32>
    %46 = vector.shape_cast %45 : vector<8xf32> to vector<8x1xf32>
    %47 = vector.broadcast %46 : vector<8x1xf32> to vector<8x6xf32>
    %48 = arith.subf %44, %47 : vector<8x6xf32>
    %49 = math.exp %48 : vector<8x6xf32>
    %cst_27 = arith.constant dense<0.000000e+00> : vector<8xf32>
    %50 = vector.multi_reduction <add>, %49, %cst_27 [1] : vector<8x6xf32> to vector<8xf32>
    %51 = vector.shape_cast %50 : vector<8xf32> to vector<8x1xf32>
    %52 = math.log %51 : vector<8x1xf32>
    %53 = vector.broadcast %52 : vector<8x1xf32> to vector<8x6xf32>
    %54 = arith.subf %48, %53 : vector<8x6xf32>
    %c0_28 = arith.constant 0 : index
    %c4 = arith.constant 4 : index
    %55 = vector.load %arg11[%c0_28, %c4] : memref<8x128xf32, #tpu.memory_space<vmem>>, vector<8x6xf32>
    tpu.vector_store %arg11[%c0_28, %c4], %54 {strides = array<i32>} : memref<8x128xf32, #tpu.memory_space<vmem>>, vector<8x6xf32>,
    %c0_29 = arith.constant 0 : index
    %c0_30 = arith.constant 0 : index
    %56 = vector.load %arg7[%c0_29, %c0_30] : memref<6x8xf32, #tpu.memory_space<vmem>>, vector<6x8xf32>
    %c0_31 = arith.constant 0 : index
    %c0_32 = arith.constant 0 : index
    %57 = vector.load %arg8[%c0_31, %c0_32] : memref<32x8xf32, #tpu.memory_space<vmem>>, vector<32x8xf32>
    %c0_33 = arith.constant 0 : index
    %c0_34 = arith.constant 0 : index
    %58 = vector.load %arg9[%c0_33, %c0_34] : memref<1x8xf32, #tpu.memory_space<vmem>>, vector<1x8xf32>
    %cst_35 = arith.constant 0.000000e+00 : f32
    %59 = vector.broadcast %cst_35 : f32 to vector<8x6xf32>
    %60 = arith.maximumf %44, %59 : vector<8x6xf32>
    %cst_36 = arith.constant dense<0.000000e+00> : vector<8xf32>
    %61 = vector.multi_reduction <add>, %60, %cst_36 [1] : vector<8x6xf32> to vector<8xf32>
    %62 = vector.shape_cast %61 : vector<8xf32> to vector<8x1xf32>
    %cst_37 = arith.constant 6.000000e+00 : f32
    %63 = vector.broadcast %cst_37 : f32 to vector<8x1xf32>
    %64 = arith.divf %62, %63 : vector<8x1xf32>
    %65 = vector.broadcast %64 : vector<8x1xf32> to vector<8x6xf32>
    %66 = arith.subf %60, %65 : vector<8x6xf32>
    %67 = arith.mulf %66, %66 : vector<8x6xf32>
    %cst_38 = arith.constant dense<0.000000e+00> : vector<8xf32>
    %68 = vector.multi_reduction <add>, %67, %cst_38 [1] : vector<8x6xf32> to vector<8xf32>
    %69 = vector.shape_cast %68 : vector<8xf32> to vector<8x1xf32>
    %cst_39 = arith.constant 6.000000e+00 : f32
    %70 = vector.broadcast %cst_39 : f32 to vector<8x1xf32>
    %71 = arith.divf %69, %70 : vector<8x1xf32>
    %cst_40 = arith.constant 9.99999974E-6 : f32
    %72 = vector.broadcast %cst_40 : f32 to vector<8x1xf32>
    %73 = arith.addf %71, %72 : vector<8x1xf32>
    %74 = math.rsqrt %73 : vector<8x1xf32>
    %75 = vector.broadcast %74 : vector<8x1xf32> to vector<8x6xf32>
    %76 = arith.mulf %66, %75 : vector<8x6xf32>
    %cst_41 = arith.constant dense<0.000000e+00> : vector<8x8xf32>
    %77 = tpu.matmul %76, %56, %cst_41 {dimension_numbers = #tpu.dot_dimension_numbers<[1], [0], [0], [1], [0, 0, 1, 1], [], []>} : vector<8x6xf32>, vector<6x8xf32>, vector<8x8xf32> -> vector<8x8xf32>
    %cst_42 = arith.constant dense<0.000000e+00> : vector<8x8xf32>
    %78 = tpu.matmul %0, %57, %cst_42 {dimension_numbers = #tpu.dot_dimension_numbers<[1], [0], [0], [1], [0, 0, 1, 1], [], []>} : vector<8x32xf32>, vector<32x8xf32>, vector<8x8xf32> -> vector<8x8xf32>
    %79 = arith.addf %77, %78 : vector<8x8xf32>
    %80 = vector.broadcast %58 : vector<1x8xf32> to vector<8x8xf32>
    %81 = arith.addf %79, %80 : vector<8x8xf32>
    %cst_43 = arith.constant dense<0xFF800000> : vector<8xf32>
    %82 = vector.multi_reduction <maximumf>, %81, %cst_43 [1] : vector<8x8xf32> to vector<8xf32>
    %83 = vector.shape_cast %82 : vector<8xf32> to vector<8x1xf32>
    %84 = vector.broadcast %83 : vector<8x1xf32> to vector<8x8xf32>
    %85 = arith.subf %81, %84 : vector<8x8xf32>
    %86 = math.exp %85 : vector<8x8xf32>
    %cst_44 = arith.constant dense<0.000000e+00> : vector<8xf32>
    %87 = vector.multi_reduction <add>, %86, %cst_44 [1] : vector<8x8xf32> to vector<8xf32>
    %88 = vector.shape_cast %87 : vector<8xf32> to vector<8x1xf32>
    %89 = math.log %88 : vector<8x1xf32>
    %90 = vector.broadcast %89 : vector<8x1xf32> to vector<8x8xf32>
    %91 = arith.subf %85, %90 : vector<8x8xf32>
    %c0_45 = arith.constant 0 : index
    %c10 = arith.constant 10 : index
    %92 = vector.load %arg11[%c0_45, %c10] : memref<8x128xf32, #tpu.memory_space<vmem>>, vector<8x8xf32>
    tpu.vector_store %arg11[%c0_45, %c10], %91 {strides = array<i32>} : memref<8x128xf32, #tpu.memory_space<vmem>>, vector<8x8xf32>,
    %c0_46 = arith.constant 0 : index
    %c0_47 = arith.constant 0 : index
    %93 = vector.load %arg10[%c0_46, %c0_47] : memref<8x128xf32, #tpu.memory_space<vmem>>, vector<8x128xf32>
    %94 = arith.negf %81 : vector<8x8xf32>
    %95 = math.exp %94 : vector<8x8xf32>
    %cst_48 = arith.constant 1.000000e+00 : f32
    %96 = vector.broadcast %cst_48 : f32 to vector<8x8xf32>
    %97 = arith.addf %96, %95 : vector<8x8xf32>
    %98 = arith.divf %96, %97 : vector<8x8xf32>
    %cst_49 = arith.constant dense<0.000000e+00> : vector<8x128xf32>
    %99 = tpu.matmul %98, %93, %cst_49 {dimension_numbers = #tpu.dot_dimension_numbers<[1], [0], [0], [1], [0, 0, 1, 1], [], []>} : vector<8x8xf32>, vector<8x128xf32>, vector<8x128xf32> -> vector<8x128xf32>
    %cst_50 = arith.constant 0.999899983 : f32
    %100 = vector.broadcast %cst_50 : f32 to vector<8x128xf32>
    %101 = arith.minimumf %99, %100 : vector<8x128xf32>
    %c0_51 = arith.constant 0 : index
    %c0_52 = arith.constant 0 : index
    %102 = vector.load %arg12[%c0_51, %c0_52] : memref<8x128xf32, #tpu.memory_space<vmem>>, vector<8x128xf32>
    tpu.vector_store %arg12[%c0_51, %c0_52], %101 {strides = array<i32>} : memref<8x128xf32, #tpu.memory_space<vmem>>, vector<8x128xf32>,
    return
  }
  func.func @transform_0(%arg0: i32) -> (i32, i32) {
    %c0_i32 = arith.constant 0 : i32
    %c0_i32_0 = arith.constant 0 : i32
    return %arg0, %c0_i32 : i32, i32
  }
  func.func @transform_1(%arg0: i32) -> (i32, i32) {
    %c0_i32 = arith.constant 0 : i32
    %c0_i32_0 = arith.constant 0 : i32
    %c0_i32_1 = arith.constant 0 : i32
    return %c0_i32, %c0_i32_0 : i32, i32
  }
  func.func @transform_2(%arg0: i32) -> (i32, i32) {
    %c0_i32 = arith.constant 0 : i32
    %c0_i32_0 = arith.constant 0 : i32
    %c0_i32_1 = arith.constant 0 : i32
    return %c0_i32, %c0_i32_0 : i32, i32
  }
  func.func @transform_3(%arg0: i32) -> (i32, i32) {
    %c0_i32 = arith.constant 0 : i32
    %c0_i32_0 = arith.constant 0 : i32
    %c0_i32_1 = arith.constant 0 : i32
    return %c0_i32, %c0_i32_0 : i32, i32
  }
  func.func @transform_4(%arg0: i32) -> (i32, i32) {
    %c0_i32 = arith.constant 0 : i32
    %c0_i32_0 = arith.constant 0 : i32
    %c0_i32_1 = arith.constant 0 : i32
    return %c0_i32, %c0_i32_0 : i32, i32
  }
  func.func @transform_5(%arg0: i32) -> (i32, i32) {
    %c0_i32 = arith.constant 0 : i32
    %c0_i32_0 = arith.constant 0 : i32
    %c0_i32_1 = arith.constant 0 : i32
    return %c0_i32, %c0_i32_0 : i32, i32
  }
  func.func @transform_6(%arg0: i32) -> (i32, i32) {
    %c0_i32 = arith.constant 0 : i32
    %c0_i32_0 = arith.constant 0 : i32
    %c0_i32_1 = arith.constant 0 : i32
    return %c0_i32, %c0_i32_0 : i32, i32
  }
  func.func @transform_7(%arg0: i32) -> (i32, i32) {
    %c0_i32 = arith.constant 0 : i32
    %c0_i32_0 = arith.constant 0 : i32
    %c0_i32_1 = arith.constant 0 : i32
    return %c0_i32, %c0_i32_0 : i32, i32
  }
  func.func @transform_8(%arg0: i32) -> (i32, i32) {
    %c0_i32 = arith.constant 0 : i32
    %c0_i32_0 = arith.constant 0 : i32
    %c0_i32_1 = arith.constant 0 : i32
    return %c0_i32, %c0_i32_0 : i32, i32
  }
  func.func @transform_9(%arg0: i32) -> (i32, i32) {
    %c0_i32 = arith.constant 0 : i32
    %c0_i32_0 = arith.constant 0 : i32
    %c0_i32_1 = arith.constant 0 : i32
    return %c0_i32, %c0_i32_0 : i32, i32
  }
  func.func @transform_10(%arg0: i32) -> (i32, i32) {
    %c0_i32 = arith.constant 0 : i32
    %c0_i32_0 = arith.constant 0 : i32
    return %arg0, %c0_i32 : i32, i32
  }
  func.func @transform_11(%arg0: i32) -> (i32, i32) {
    %c0_i32 = arith.constant 0 : i32
    %c0_i32_0 = arith.constant 0 : i32
    return %arg0, %c0_i32 : i32, i32
  }
}

</mosaic_0001>

<bundles_post_ra>
// kernel: bhcn_awx_forward.1
= control target key start
LH: loop header
LB: loop body
LE: loop exit
PB: predicated region body
PF: predicated region fallthrough
CT: control target
= control target key end

     0   :  { %17 = vsyncpa [#allocation3], 0  ;;  %v812_v3 = vmov 0.0|0.0   ;;  %vm813_vm0 = vmmov 0   ;;  %v814_v6 = vmov 0.0   ;;  %s1009_s0 = inlined_call_operand.vmem [shape: f32[8,32], index: 0, kind: input, shape index: {}]   ;;  %s1010_s1 = inlined_call_operand.vmem [shape: f32[32,4], index: 1, kind: input, shape index: {}]   ;;  %s1011_s2 = inlined_call_operand.vmem [shape: f32[1,4], index: 2, kind: input, shape index: {}]   ;;  %s1012_s3 = inlined_call_operand.vmem [shape: f32[4,6], index: 3, kind: input, shape index: {}]   ;;  %s1013_s4 = inlined_call_operand.vmem [shape: f32[32,6], index: 4, kind: input, shape index: {}]   ;;  %s1014_s5 = inlined_call_operand.vmem [shape: f32[1,6], index: 5, kind: input, shape index: {}]   ;;  %s1015_s6 = inlined_call_operand.vmem [shape: f32[6,8], index: 6, kind: input, shape index: {}]   ;;  %s1016_s7 = inlined_call_operand.vmem [shape: f32[32,8], index: 7, kind: input, shape index: {}]   ;;  %s1017_s8 = inlined_call_operand.vmem [shape: f32[1,8], index: 8, kind: input, shape index: {}]   ;;  %s1018_s9 = inlined_call_operand.vmem [shape: f32[8,128], index: 9, kind: input, shape index: {}]   ;;  %s1019_s10 = inlined_call_operand.hbm [shape: f32[8,128], index: 10, kind: output, shape index: {0}]   ;;  %s1020_s11 = inlined_call_operand.hbm [shape: f32[8,128], index: 11, kind: output, shape index: {1}]  }
   0x1   :  { %v41_v0 = vld [vmem:[%s1010_s1] sm:$0xff]  ;;  %v42_v1 = vld [vmem:[%s1010_s1 + $0x8] sm:$0xff]  ;;  %v43_v2 = vld [vmem:[%s1010_s1 + $0x10] sm:$0xff]  ;;  %719 = vmatprep.subr.bf16.mxu0 %v812_v3  ;;  %679 = vmatprep.mubr.msk.f32.mxu0 %vm813_vm0, %v814_v6  ;;  %40 = vst [vmem:[#allocation2] sm:$0xff] %v814_v6 }
   0x2   :  { %v720_v4 = vpack.c.bf16 %v42_v1, %v41_v0  ;;  %v44_v5 = vld [vmem:[%s1010_s1 + $0x18] sm:$0xff]  ;;  %725 = vmatprep.subr.bf16.mxu1 %v812_v3  ;;  %690 = vmatprep.mubr.msk.f32.mxu1 %vm813_vm0, %v814_v6 }
   0x3   :  { %18 = vsyncpa [#allocation5], 0  ;;  %v723_v7 = vpack.c.bf16 %v44_v5, %v43_v2  ;;  %v902_v8 = vld [vmem:[%s1009_s0] sm:$0xff]  ;;  %vm52_vm1 = vcmask 261120   ;;  %vm126_vm2 = vcmask 31744   ;;  %v142_v21 = vld [vmem:[%s1013_s4 + $0x8] sm:$0xff] }
   0x4   :  { %721 = vmatpush3.bf16.msra.mxu0 %v720_v4  ;;  %v638_v9 = vld [vmem:[%s1011_s2] ss:$0 sm:$0xff]  ;;  %v143_v22 = vld [vmem:[%s1013_s4 + $0x10] sm:$0xff]  ;;  %vm234_vm3 = vcmask 1043456   ;;  %v144_v24 = vld [vmem:[%s1013_s4 + $0x18] sm:$0xff]  ;;  %vm315_vm4 = vcmask 48128  }
   0x5   :  { %722 = vmatprep.subr.bf16.mxu0 %v812_v3  ;;  %v141_v20 = vld [vmem:[%s1013_s4] sm:$0xff]  ;;  %v729_v26 = vpack.c.bf16 %v144_v24, %v143_v22  ;;  %v336_v49 = vld [vmem:[%s1016_s7 + $0x8] sm:$0xff]  ;;  %v337_v50 = vld [vmem:[%s1016_s7 + $0x10] sm:$0xff]  ;;  %vm428_vm5 = vcmask 1045504   ;;  %vm509_vm6 = vcmask 64512   ;;  %vm332_vm7 = vcmask 80928  }
   0x6   :  { %v726_v23 = vpack.c.bf16 %v142_v21, %v141_v20  ;;  %v140_v25 = vld [vmem:[%s1012_s3] sm:$0xf]  ;;  %v338_v52 = vld [vmem:[%s1016_s7 + $0x18] sm:$0xff] }
   0x7   :  { %v643_v34 = vld [vmem:[%s1014_s5] ss:$0 sm:$0xff]  ;;  %v735_v54 = vpack.c.bf16 %v338_v52, %v337_v50 }
   0x8   :  { %724 = vmatpush3.bf16.msra.mxu0 %v723_v7  ;;  %727 = vmatpush3.bf16.msra.mxu1 %v726_v23  ;;  %v335_v48 = vld [vmem:[%s1016_s7] sm:$0xff] }
   0x9   :  { %693 = vmatprep.subr.mxu0 %v814_v6  ;;  %728 = vmatprep.subr.bf16.mxu1 %v812_v3  ;;  %v732_v51 = vpack.c.bf16 %v336_v49, %v335_v48  ;;  %v334_v53 = vld [vmem:[%s1015_s6] sm:$0x3f] }
   0xa   :  { %v528_v62 = vld [vmem:[%s1018_s9] sm:$0xff]  ;;  %s816_s9 = smov [#allocation4]  }
   0xb   :  { %680 = vmatmul.mubr.msk.f32.vlgmr.msra.gmra.mrb[0].mxu0 %vm52_vm1, %v902_v8  ;;  %v647_v5 = vld [vmem:[%s1017_s8] ss:$0 sm:$0xff]  ;;  %s815_s8 = smov 4   ;;  %s626_s27 = sshll.u32 %s816_s9, 4  ;;  %s627_s27 = int_to_ptr.vmem [resolvable:$true] %s626_s27 }
   0xc   :  { %695 = vmatprep.mubr.msk.f32.mxu0 %vm813_vm0, %v814_v6  ;;  %694 = vmatpush3.msk.msra.mxu0 %vm234_vm3, %v140_v25  ;;  %s764_s0 = scalar_lea.vmem %s627_s27, 128  ;;  %p769_p1 = scmp.lt.s32.totalorder %s627_s27, %s627_s27 }
   0xd   :  { %709 = vmatprep.subr.mxu0 %v814_v6  ;;  %730 = vmatpush3.bf16.msra.mxu1 %v729_v26  ;;  %p765_p0 = scmp.ne.s32.totalorder %s627_s27, %s764_s0  ;;  %p770_p2 = scmp.lt.s32.totalorder %s764_s0, %s764_s0 }
   0xe   :  { %731 = vmatprep.subr.bf16.mxu1 %v812_v3 }
   0xf   :  { %p771_p3 = por %p770_p2, %p769_p1 }
  0x10   :  { %691 = vmatmul.mubr.msk.f32.vlgmr.msra.gmra.mrb[0].mxu1 %vm52_vm1, %v902_v8 }
  0x11   :  { %706 = vmatprep.mubr.msk.f32.mxu1 %vm813_vm0, %v814_v6  ;;  %733 = vmatpush3.bf16.msra.mxu1 %v732_v51  ;;  %p772_p4 = pnand %p771_p3, %p765_p0 }
  0x12   :  { %734 = vmatprep.subr.bf16.mxu1 %v812_v3 }
  0x15   :  { %736 = vmatpush3.bf16.msra.mxu1 %v735_v54 }
  0x18   :  { %707 = vmatmul.mubr.msk.f32.vlgmr.msra.gmra.mrb[2].mxu1 %vm52_vm1, %v902_v8 }
  0xde   :  { %v122_v10 = vpop.f32.mrb[0].mxu0 }
  0xdf   :  { %v912_v11 = vadd.f32 %v638_v9, %v122_v10  ;;  %v681_v12 = vpop.f32.mrb[1].mxu0 }
  0xe1   :  { %v146_v13 = vmax.f32 %v912_v11, 0.0  ;;  %v127_v42 = vsel %vm126_vm2, %v912_v11, -inf }
  0xe3   :  { %v147_v14 = vsel %vm126_vm2, %v146_v13, 0.0  ;;  %v227_v32 = vpop.f32.mrb[0].mxu1 }
  0xe4   :  { %148 = vadd.xlane.f32.xlu0 %v147_v14  ;;  %v692_v33 = vpop.f32.mrb[1].mxu1 }
  0xeb   :  { %v421_v60 = vpop.f32.mrb[2].mxu1 }
  0xec   :  { %v708_v61 = vpop.f32.mrb[3].mxu1 }
 0x171   :  { %v149_v15 = vpop.xlane.xlu0 %148 }
 0x172   :  { %v151_v16 = vmul.f32 0.25, %v149_v15 }
 0x174   :  { %v152_v17 = vsub.f32 %v146_v13, %v151_v16 }
 0x176   :  { %v153_v18 = vmul.f32 %v152_v17, %v152_v17 }
 0x178   :  { %v154_v19 = vsel %vm126_vm2, %v153_v18, 0.0 }
 0x179   :  { %155 = vadd.xlane.f32.xlu0 %v154_v19 }
 0x206   :  { %v156_v27 = vpop.xlane.xlu0 %155 }
 0x207   :  { %v157_v28 = vmul.f32 0.25, %v156_v27 }
 0x209   :  { %v158_v29 = vadd.f32 1e-05, %v157_v28 }
 0x20b   :  { %744 = vrsqrt.f32 %v158_v29 }
 0x215   :  { %v745_v30 = vpop.eup %744 }
 0x216   :  { %v160_v31 = vmul.f32 %v745_v30, %v152_v17 }
 0x218   :  { %696 = vmatmul.mubr.msk.f32.vlgmr.msra.gmra.mrb[2].mxu0 %vm126_vm2, %v160_v31 }
 0x219   :  { %711 = vmatprep.mubr.msk.f32.mxu0 %vm813_vm0, %v814_v6  ;;  %710 = vmatpush3.msk.msra.mxu0 %vm428_vm5, %v334_v53 }
 0x21a   :  { %714 = vmatprep.subr.mxu0 %v814_v6 }
 0x2eb   :  { %v304_v35 = vpop.f32.mrb[2].mxu0 }
 0x2ec   :  { %v305_v36 = vadd.f32 %v304_v35, %v227_v32  ;;  %v697_v37 = vpop.f32.mrb[3].mxu0 }
 0x2ee   :  { %v314_v38 = vadd.f32 %v643_v34, %v305_v36 }
 0x2f0   :  { %v316_v39 = vsel %vm315_vm4, %v314_v38, -inf  ;;  %v340_v40 = vmax.f32 %v314_v38, 0.0 }
 0x2f1   :  { %317 = vmax.xlane.f32.xlu0 %v316_v39 }
 0x2f2   :  { %v341_v41 = vsel %vm315_vm4, %v340_v40, 0.0 }
 0x2f3   :  { %342 = vadd.xlane.f32.xlu1 %v341_v41 }
 0x2f5   :  { %128 = vmax.xlane.f32.xlu0 %v127_v42 }
 0x37e   :  { %v318_v63 = vpop.xlane.xlu0 %317 }
 0x37f   :  { %v319_v0 = vsub.f32 %v314_v38, %v318_v63 }
 0x380   :  { %v343_v43 = vpop.xlane.xlu1 %342 }
 0x381   :  { %v345_v44 = vmul.f32 0.16666667, %v343_v43  ;;  %v320_v2 = vmul.f32 1.442695, %v319_v0 }
 0x382   :  { %v129_v1 = vpop.xlane.xlu0 %128 }
 0x383   :  { %v346_v45 = vsub.f32 %v340_v40, %v345_v44  ;;  %v130_v3 = vsub.f32 %v912_v11, %v129_v1 }
 0x385   :  { %v347_v46 = vmul.f32 %v346_v45, %v346_v45  ;;  %v131_v4 = vmul.f32 1.442695, %v130_v3 }
 0x387   :  { %v348_v47 = vsel %vm315_vm4, %v347_v46, 0.0 }
 0x388   :  { %349 = vadd.xlane.f32.xlu1 %v348_v47 }
 0x415   :  { %v350_v55 = vpop.xlane.xlu1 %349 }
 0x416   :  { %v351_v56 = vmul.f32 0.16666667, %v350_v55 }
 0x418   :  { %v352_v57 = vadd.f32 1e-05, %v351_v56 }
 0x41a   :  { %746 = vrsqrt.f32 %v352_v57 }
 0x41b   :  { %748 = vpow2.f32 %v320_v2 }
 0x41c   :  { %750 = vpow2.f32 %v131_v4 }
 0x424   :  { %v747_v58 = vpop.eup %746 }
 0x425   :  { %v354_v59 = vmul.f32 %v747_v58, %v346_v45  ;;  %v749_v13 = vpop.eup %748 }
 0x426   :  { %v322_v11 = vsel %vm315_vm4, %v749_v13, 0.0  ;;  %v751_v14 = vpop.eup %750 }
 0x427   :  { %712 = vmatmul.mubr.msk.f32.vlgmr.msra.gmra.mrb[4].mxu0 %vm315_vm4, %v354_v59  ;;  %v133_v15 = vsel %vm126_vm2, %v751_v14, 0.0 }
 0x428   :  { %716 = vmatprep.mubr.msk.f32.mxu0 %vm813_vm0, %v814_v6  ;;  %715 = vmatpush3.msra.mxu0 %v528_v62 }
 0x4fa   :  { %v498_v6 = vpop.f32.mrb[4].mxu0 }
 0x4fb   :  { %v499_v7 = vadd.f32 %v498_v6, %v421_v60  ;;  %v713_v8 = vpop.f32.mrb[5].mxu0 }
 0x4fd   :  { %v508_v9 = vadd.f32 %v647_v5, %v499_v7 }
 0x4ff   :  { %v648_v10 = vmul.f32 -1.442695, %v508_v9  ;;  %v510_v12 = vsel %vm509_vm6, %v508_v9, -inf }
 0x500   :  { %511 = vmax.xlane.f32.xlu1 %v510_v12 }
 0x501   :  { %752 = vpow2.f32 %v648_v10 }
 0x504   :  { %323 = vadd.xlane.f32.xlu1 %v322_v11 }
 0x508   :  { %134 = vadd.xlane.f32.xlu1 %v133_v15 }
 0x50b   :  { %v753_v16 = vpop.eup %752 }
 0x50c   :  { %v532_v17 = vadd.f32 1.0, %v753_v16 }
 0x50e   :  { %754 = vrcp.f32 %v532_v17 }
 0x518   :  { %v755_v18 = vpop.eup %754 }
 0x519   :  { %717 = vmatmul.mubr.msk.f32.vlgmr.msra.gmra.mrb[6].mxu0 %vm509_vm6, %v755_v18 }
 0x58d   :  { %v512_v19 = vpop.xlane.xlu1 %511 }
 0x58e   :  { %v513_v20 = vsub.f32 %v508_v9, %v512_v19 }
 0x590   :  { %v514_v21 = vmul.f32 1.442695, %v513_v20 }
 0x591   :  { %v324_v22 = vpop.xlane.xlu1 %323 }
 0x592   :  { %756 = vpow2.f32 %v514_v21 }
 0x595   :  { %v135_v23 = vpop.xlane.xlu1 %134 }
 0x596   :  { %758 = vlog2.f32 %v135_v23 }
 0x597   :  { %760 = vlog2.f32 %v324_v22 }
 0x59c   :  { %v757_v24 = vpop.eup %756 }
 0x59d   :  { %v516_v25 = vsel %vm509_vm6, %v757_v24, 0.0 }
 0x59e   :  { %517 = vadd.xlane.f32.xlu0 %v516_v25 }
 0x5a0   :  { %v759_v26 = vpop.eup %758 }
 0x5a1   :  { %v137_v27 = vmul.f32 0.6931472, %v759_v26  ;;  %v761_v29 = vpop.eup %760 }
 0x5a2   :  { %v326_v30 = vmul.f32 0.6931472, %v761_v29 }
 0x5a3   :  { %v138_v28 = vsub.f32 %v130_v3, %v137_v27 }
 0x5a4   :  { %v327_v31 = vsub.f32 %v319_v0, %v326_v30 }
 0x5a5   :  { %139 = vst.msk [vmem:[#allocation2] sm:$0xff] %vm126_vm2, %v138_v28 }
 0x5b4   :  { %329 = vrot.lane.b32.xlu0 %v327_v31, %s815_s8 }
 0x5ec   :  { %v604_v32 = vpop.f32.mrb[6].mxu0 }
 0x5ed   :  { %v608_v33 = vmin.f32 %v604_v32, 0.9999  ;;  %v718_v34 = vpop.f32.mrb[7].mxu0 }
 0x5ef   :  { %609 = vst [vmem:[#allocation4] sm:$0xff] %v608_v33 }
 0x62b   :  { %v518_v35 = vpop.xlane.xlu0 %517 }
 0x62c   :  { %762 = vlog2.f32 %v518_v35 }
 0x62f   :  { %v330_v36 = vpop.permute.xlu0 %329 }
 0x630   :  { %333 = vst.msk [vmem:[#allocation2] sm:$0xff] %vm332_vm7, %v330_v36 }
 0x631   :  { %775 = shalt.err (!%p772_p4)
}
 0x632   :  { %s776_s29 = scalar_lea.hbm %s1020_s11, 128 }
 0x633   :  { %p777_p5 = scmp.ne.s32.totalorder %s1020_s11, %s776_s29  ;;  %p780_p6 = scmp.lt.u32.totalorder %s776_s29, %s1020_s11 }
 0x635   :  { %p782_p7 = pnand %p780_p6, %p777_p5 }
 0x637   :  { %785 = shalt.err (!%p782_p7)
}
 0x638   :  { %629 = dma.vmem_to_hbm [thread:$0]  %s627_s27, 128, %s1020_s11, [#allocation5]   ;;  %v763_v37 = vpop.eup %762  ;;  %vm526_vm8 = vcmask 146512  }
 0x639   :  { %v520_v38 = vmul.f32 0.6931472, %v763_v37  ;;  %s817_s3 = smov 10   ;;  %s818_s4 = smov [#allocation2]  }
 0x63a   :  { %s616_s5 = sshll.u32 %s818_s4, 4  ;;  %s617_s5 = int_to_ptr.vmem [resolvable:$true] %s616_s5 }
 0x63b   :  { %v521_v39 = vsub.f32 %v513_v20, %v520_v38  ;;  %s786_s17 = scalar_lea.vmem %s617_s5, 128  ;;  %p791_p9 = scmp.lt.s32.totalorder %s617_s5, %s617_s5 }
 0x63c   :  { %p787_p8 = scmp.ne.s32.totalorder %s617_s5, %s786_s17  ;;  %p792_p10 = scmp.lt.s32.totalorder %s786_s17, %s786_s17 }
 0x63d   :  { %523 = vrot.lane.b32.xlu1 %v521_v39, %s817_s3 }
 0x63e   :  { %p793_p11 = por %p792_p10, %p791_p9 }
 0x640   :  { %p794_p12 = pnand %p793_p11, %p787_p8 }
 0x6af   :  { %v524_v40 = vpop.permute.xlu1 %523 }
 0x6b0   :  { %527 = vst.msk [vmem:[#allocation2] sm:$0xff] %vm526_vm8, %v524_v40 }
 0x6b1   :  { %797 = shalt.err (!%p794_p12)
}
 0x6b2   :  { %s798_s19 = scalar_lea.hbm %s1019_s10, 128 }
 0x6b3   :  { %p799_p13 = scmp.ne.s32.totalorder %s1019_s10, %s798_s19  ;;  %p802_p0 = scmp.lt.u32.totalorder %s798_s19, %s1019_s10 }
 0x6b5   :  { %p804_p1 = pnand %p802_p0, %p799_p13 }
 0x6b7   :  { %807 = shalt.err (!%p804_p1)
}
 0x6b8   :  { %619 = dma.vmem_to_hbm [thread:$0]  %s617_s5, 128, %s1019_s10, [#allocation3]  }
 0x6b9   :  { %808 = dma.done.wait [#allocation3], 128  }
 0x6ba   :  { %809 = vsyncadd [#allocation3], 4294967168 }
 0x6bb   :  { %810 = dma.done.wait [#allocation5], 128  }
 0x6bc   :  { %811 = vsyncadd [#allocation5], 4294967168 }
 0x6bd   :  { %636 = vsyncpa [#allocation3], 1 }
 0x6be   :  { %637 = vsyncpa [#allocation5], 1 }

</bundles_post_ra>
